<compile_context>
chip_gen: v5e
topology: v5e:2x2
jax: 0.10.0
libtpu: 0.0.40
codegen_flags: <defaults>
</compile_context>

<pallas_src>
import functools

import jax
import jax.numpy as jnp
from jax import lax
from jax.experimental import pallas as pl
from jax.experimental.pallas import tpu as pltpu


# --------------------------------------------------------------------------- #
# Hardware-aware sizing helpers
# --------------------------------------------------------------------------- #
@functools.lru_cache(maxsize=None)
def _vmem_limit():
    """~75% of physical VMEM (96 MiB on v5e/v6e, 48 MiB on v7x, 48 MiB fallback)."""
    try:
        cap = int(pltpu.get_tpu_info().vmem_capacity_bytes)
    except Exception:
        cap = 64 * 1024 * 1024  # conservative: v7x physical VMEM per TensorCore
    return max(32 * 1024 * 1024, int(cap * 0.75))


def _pick_row_tile(m, c, itemsize):
    """Largest row tile for the projection kernels that fits the VMEM budget."""
    budget = _vmem_limit() // 24  # ~a dozen (tm,C) live buffers + resident weights
    for t in (1024, 512, 256, 128, 64, 32, 16, 8):
        if t <= m and m % t == 0 and t * c * itemsize <= budget:
            return t
    return m  # TODO(synk): pad + pl.cdiv grid for ragged / prime M


def _pick_q_tile(n, cap=256):
    """Attention q tile, capped (decoupled from the projection tile picker)."""
    for t in (256, 128, 64, 32, 16, 8):
        if t <= cap and t <= n and n % t == 0:
            return t
    return n  # TODO(synk): pad + pl.cdiv grid for ragged / prime N


def _pick_head_group(h, tq, n, score_budget=8 * 1024 * 1024):
    """Heads per attention grid step: divides H, sublane-friendly, bounded scores."""
    cands = [g for g in range(1, h + 1) if h % g == 0 and (g == h or g % 8 == 0)]
    fitting = [g for g in cands if g * tq * n * 4 <= score_budget]
    return max(fitting) if fitting else min(cands)


@functools.lru_cache(maxsize=None)
def _single_buffer_ok():
    """Feature-detect pipeline_mode=pl.Buffered(1) on this JAX/Mosaic build."""
    try:
        def k(x_ref, o_ref):
            o_ref[...] = x_ref[...]

        x = jnp.zeros((8, 128), jnp.float32)
        pl.pallas_call(
            k,
            out_shape=jax.ShapeDtypeStruct((8, 128), jnp.float32),
            grid=(1,),
            in_specs=[pl.BlockSpec((8, 128), lambda i: (0, 0),
                                   pipeline_mode=pl.Buffered(1))],
            out_specs=pl.BlockSpec((8, 128), lambda i: (0, 0)),
        )(x)
        return True
    except Exception:
        return False


def _resident(shape, block_index=None):
    """BlockSpec for a block whose index never changes (weights / bias).

    Single-buffered when supported: the block is revisited every grid step, so
    double-buffering would only duplicate it in VMEM with zero benefit.
    """
    if block_index is None:
        block_index = (0,) * len(shape)
    idx = lambda *_, _bi=tuple(block_index): _bi
    if _single_buffer_ok():
        return pl.BlockSpec(shape, idx, pipeline_mode=pl.Buffered(1))
    return pl.BlockSpec(shape, idx)


# --------------------------------------------------------------------------- #
# Kernels
# --------------------------------------------------------------------------- #
def _qkv_kernel(x_ref, wq_ref, wk_ref, wv_ref, q_ref, k_ref, v_ref):
    # x_ref: (tm, C)   w*_ref: (C, C) column blocks of the fused weight
    x = x_ref[...]  # native dtype -> MXU; f32 accumulation via preferred_element_type
    q_ref[...] = jnp.dot(x, wq_ref[...],
                         preferred_element_type=jnp.float32).astype(q_ref.dtype)
    k_ref[...] = jnp.dot(x, wk_ref[...],
                         preferred_element_type=jnp.float32).astype(k_ref.dtype)
    v_ref[...] = jnp.dot(x, wv_ref[...],
                         preferred_element_type=jnp.float32).astype(v_ref.dtype)


def _attn_kernel(q_ref, k_ref, v_ref, o_ref, *, scale, heads):
    # q_ref/o_ref: (1, tq, G, Dh)   k_ref/v_ref: (1, N, G, Dh)
    for h in range(heads):  # static unroll over the head group
        q = q_ref[0, :, h, :] * scale                     # (tq, Dh)
        k = k_ref[0, :, h, :]                             # (N, Dh)
        v = v_ref[0, :, h, :]                             # (N, Dh)
        s = lax.dot_general(q, k, (((1,), (1,)), ((), ())),
                            preferred_element_type=jnp.float32)   # (tq, N) f32
        m = jnp.max(s, axis=-1, keepdims=True)
        p = jnp.exp(s - m)                                # EUP
        l = jnp.sum(p, axis=-1, keepdims=True)            # XLU
        o = jnp.dot(p.astype(v.dtype), v, preferred_element_type=jnp.float32)
        o_ref[0, :, h, :] = (o * pl.reciprocal(l, approx=True)).astype(o_ref.dtype)


def _proj_kernel(x_ref, w_ref, b_ref, o_ref):
    # x_ref: (tm, C)   w_ref: (C, C)   b_ref: (1, C)
    y = jnp.dot(x_ref[...], w_ref[...], preferred_element_type=jnp.float32)
    o_ref[...] = (y + b_ref[...].astype(jnp.float32)).astype(o_ref.dtype)


# --------------------------------------------------------------------------- #
# pallas_call wrappers
# --------------------------------------------------------------------------- #
def _qkv_proj(x2, w_qkv):
    m, c = x2.shape
    tm = _pick_row_tile(m, c, x2.dtype.itemsize)
    out_sd = jax.ShapeDtypeStruct((m, c), x2.dtype)

    # TODO(synk): for very large C on v7x, add an output-column grid axis so
    # resident weight VMEM is 3*C*tn instead of 3*C^2.
    if c % 128 == 0:
        # Fused weight passed three times; column block picked by index_map.
        w_in = (w_qkv, w_qkv, w_qkv)
        w_specs = [_resident((c, c), (0, j)) for j in range(3)]
    else:
        # Fallback for C not a multiple of 128 (lane-alignment of the column
        # block): wrapper-side split (extra HBM copy, small C only).
        w_in = (w_qkv[:, :c], w_qkv[:, c:2 * c], w_qkv[:, 2 * c:])
        w_specs = [_resident((c, c)) for _ in range(3)]

    return pl.pallas_call(
        _qkv_kernel,
        out_shape=(out_sd, out_sd, out_sd),
        grid_spec=pltpu.PrefetchScalarGridSpec(
            num_scalar_prefetch=0,
            grid=(m // tm,),
            in_specs=[pl.BlockSpec((tm, c), lambda i: (i, 0))] + w_specs,
            out_specs=(pl.BlockSpec((tm, c), lambda i: (i, 0)),) * 3,
        ),
        compiler_params=pltpu.CompilerParams(
            dimension_semantics=("parallel",),
            vmem_limit_bytes=_vmem_limit(),
        ),
    )(x2, *w_in)


def _attention_core(q4, k4, v4, *, scale):
    b, n, hh, dh = q4.shape
    tq = _pick_q_tile(n)
    g = _pick_head_group(hh, tq, n)
    kern = functools.partial(_attn_kernel, scale=scale, heads=g)
    # TODO(synk): for very long N, add a K/V tile grid axis (innermost,
    # "arbitrary") with an online-softmax (flash) accumulator so VMEM stays
    # flat in N instead of keeping full K/V of the head group resident.
    return pl.pallas_call(
        kern,
        out_shape=jax.ShapeDtypeStruct((b, n, hh, dh), q4.dtype),
        grid_spec=pltpu.PrefetchScalarGridSpec(
            num_scalar_prefetch=0,
            grid=(b, hh // g, n // tq),          # q-tile innermost: K/V fetched
            in_specs=[                            # once per (batch, head-group)
                pl.BlockSpec((1, tq, g, dh), lambda bi, hg, jq: (bi, jq, hg, 0)),
                pl.BlockSpec((1, n, g, dh), lambda bi, hg, jq: (bi, 0, hg, 0)),
                pl.BlockSpec((1, n, g, dh), lambda bi, hg, jq: (bi, 0, hg, 0)),
            ],
            out_specs=pl.BlockSpec((1, tq, g, dh),
                                   lambda bi, hg, jq: (bi, jq, hg, 0)),
        ),
        compiler_params=pltpu.CompilerParams(
            dimension_semantics=("parallel", "parallel", "parallel"),
            vmem_limit_bytes=_vmem_limit(),
        ),
    )(q4, k4, v4)


def _out_proj(x2, w, b2):
    m, c = x2.shape
    tm = _pick_row_tile(m, c, x2.dtype.itemsize)
    return pl.pallas_call(
        _proj_kernel,
        out_shape=jax.ShapeDtypeStruct((m, c), x2.dtype),
        grid_spec=pltpu.PrefetchScalarGridSpec(
            num_scalar_prefetch=0,
            grid=(m // tm,),
            in_specs=[
                pl.BlockSpec((tm, c), lambda i: (i, 0)),
                _resident((c, c)),      # proj weight (resident)
                _resident((1, c)),      # proj bias (resident)
            ],
            out_specs=pl.BlockSpec((tm, c), lambda i: (i, 0)),
        ),
        compiler_params=pltpu.CompilerParams(
            dimension_semantics=("parallel",),
            vmem_limit_bytes=_vmem_limit(),
        ),
    )(x2, w, b2)


def attention_forward(x, w_qkv, w_proj, b_proj, *, num_heads, compute_dtype=None):
    """RAR Attention forward (eval mode).

    x:      (B, N, C)
    w_qkv:  (C, 3C)  == torch qkv.weight.T   (qkv_bias=False, module default)
    w_proj: (C, C)   == torch proj.weight.T
    b_proj: (C,)
    compute_dtype: optional MXU operand dtype (e.g. jnp.bfloat16); f32 stats
                   and accumulation are kept either way.
    """
    b, n, c = x.shape
    h = num_heads
    assert c % h == 0, "dim should be divisible by num_heads"
    dh = c // h
    m = b * n
    orig_dtype = x.dtype

    if compute_dtype is not None:
        x = x.astype(compute_dtype)
        w_qkv = w_qkv.astype(compute_dtype)
        w_proj = w_proj.astype(compute_dtype)
        b_proj = b_proj.astype(compute_dtype)

    x2 = x.reshape(m, c)
    q2, k2, v2 = _qkv_proj(x2, w_qkv)

    # (M, C) -> (B, N, H, Dh): pure dim split of contiguous axes (free view),
    # heads are indexed by the attention BlockSpecs — no transposes.
    q4 = q2.reshape(b, n, h, dh)
    k4 = k2.reshape(b, n, h, dh)
    v4 = v2.reshape(b, n, h, dh)

    # TODO(synk): qk_norm=True, qkv_bias=True, attn_mask, dropout and the
    # stateful kv_cache path are not implemented (module defaults / eval mode
    # make them no-ops here).
    o4 = _attention_core(q4, k4, v4, scale=float(dh) ** -0.5)

    # (B, N, H, Dh) -> (M, C): pure dim merge (free view), no transpose.
    o2 = o4.reshape(m, c)
    out2 = _out_proj(o2, w_proj, b_proj.reshape(1, c))
    out = out2.reshape(b, n, c)
    return out if out.dtype == orig_dtype else out.astype(orig_dtype)


# --------------------------------------------------------------------------- #
# Pure-JAX reference
# --------------------------------------------------------------------------- #
def _reference(x, w_qkv, w_proj, b_proj, num_heads):
    b, n, c = x.shape
    h = num_heads
    dh = c // h
    hp = lax.Precision.HIGHEST
    qkv = jnp.einsum('bnc,cd->bnd', x, w_qkv, precision=hp)
    qkv = qkv.reshape(b, n, 3, h, dh).transpose(2, 0, 3, 1, 4)
    q, k, v = qkv[0], qkv[1], qkv[2]                       # (B, H, N, Dh)
    s = jnp.einsum('bhqd,bhkd->bhqk', q, k, precision=hp) * (dh ** -0.5)
    p = jax.nn.softmax(s, axis=-1)
    o = jnp.einsum('bhqk,bhkd->bhqd', p, v, precision=hp)
    o = o.transpose(0, 2, 1, 3).reshape(b * n, c)
    out = jnp.einsum('mc,cd->md', o, w_proj, precision=hp)
    return out.reshape(b, n, c) + b_proj


if __name__ == "__main__":
    key = jax.random.PRNGKey(0)
    # Small shapes; C is a multiple of 128 so the fused-weight BlockSpec
    # column-indexing path is exercised.  head_dim = 32.
    B, N, C, H = 2, 16, 128, 4

    kx, kw1, kw2, kb = jax.random.split(key, 4)
    x = jax.random.normal(kx, (B, N, C), dtype=jnp.float32)
    w_qkv = jax.random.normal(kw1, (C, 3 * C), dtype=jnp.float32) / jnp.sqrt(C)
    w_proj = jax.random.normal(kw2, (C, C), dtype=jnp.float32) / jnp.sqrt(C)
    b_proj = jax.random.normal(kb, (C,), dtype=jnp.float32) * 0.01

    out = attention_forward(x, w_qkv, w_proj, b_proj, num_heads=H)
    out = jax.block_until_ready(out)

    ref = _reference(x, w_qkv, w_proj, b_proj, H)
    assert out.shape == (B, N, C)
    rel_err = float(jnp.linalg.norm(out - ref) / (jnp.linalg.norm(ref) + 1e-12))
    assert rel_err < 1e-2, f"relative error too large: {rel_err}"

    print("KERNEL_OK")
</pallas_src>

<mosaic_0001>
module attributes {stable_mosaic.version = 11 : i64} {
  func.func @k(%arg0: i32, %arg1: memref<8x128xf32, #tpu.memory_space<vmem>>, %arg2: memref<8x128xf32, #tpu.memory_space<vmem>>) attributes {dimension_semantics = [#tpu.dimension_semantics<arbitrary>], iteration_bounds = array<i64: 1>, scalar_prefetch = 0 : i64, scratch_operands = 0 : i64, tpu.core_type = #tpu.core_type<tc>, window_params = [{pipeline_mode = #tpu.pipeline_mode<synchronous>, transform_indices = @transform_0, window_bounds = array<i64: 8, 128>}, {pipeline_mode = #tpu.pipeline_mode<synchronous>, transform_indices = @transform_1, window_bounds = array<i64: 8, 128>}]} {
    %c0 = arith.constant 0 : index
    %c0_0 = arith.constant 0 : index
    %0 = vector.load %arg1[%c0, %c0_0] : memref<8x128xf32, #tpu.memory_space<vmem>>, vector<8x128xf32>
    %c0_1 = arith.constant 0 : index
    %c0_2 = arith.constant 0 : index
    %1 = vector.load %arg2[%c0_1, %c0_2] : memref<8x128xf32, #tpu.memory_space<vmem>>, vector<8x128xf32>
    tpu.vector_store %arg2[%c0_1, %c0_2], %0 {strides = array<i32>} : memref<8x128xf32, #tpu.memory_space<vmem>>, vector<8x128xf32>,
    return
  }
  func.func @transform_0(%arg0: i32) -> (i32, i32) {
    %c0_i32 = arith.constant 0 : i32
    %c0_i32_0 = arith.constant 0 : i32
    %c0_i32_1 = arith.constant 0 : i32
    return %c0_i32, %c0_i32_0 : i32, i32
  }
  func.func @transform_1(%arg0: i32) -> (i32, i32) {
    %c0_i32 = arith.constant 0 : i32
    %c0_i32_0 = arith.constant 0 : i32
    %c0_i32_1 = arith.constant 0 : i32
    return %c0_i32, %c0_i32_0 : i32, i32
  }
}

module attributes {stable_mosaic.version = 11 : i64} {
  func.func @_qkv_kernel(%arg0: i32, %arg1: memref<32x128xf32, #tpu.memory_space<vmem>>, %arg2: memref<128x128xf32, #tpu.memory_space<vmem>>, %arg3: memref<128x128xf32, #tpu.memory_space<vmem>>, %arg4: memref<128x128xf32, #tpu.memory_space<vmem>>, %arg5: memref<32x128xf32, #tpu.memory_space<vmem>>, %arg6: memref<32x128xf32, #tpu.memory_space<vmem>>, %arg7: memref<32x128xf32, #tpu.memory_space<vmem>>) attributes {dimension_semantics = [#tpu.dimension_semantics<parallel>], iteration_bounds = array<i64: 1>, scalar_prefetch = 0 : i64, scratch_operands = 0 : i64, tpu.core_type = #tpu.core_type<tc>, window_params = [{transform_indices = @transform_0, window_bounds = array<i64: 32, 128>}, {transform_indices = @transform_1, window_bounds = array<i64: 128, 128>}, {transform_indices = @transform_2, window_bounds = array<i64: 128, 128>}, {transform_indices = @transform_3, window_bounds = array<i64: 128, 128>}, {transform_indices = @transform_4, window_bounds = array<i64: 32, 128>}, {transform_indices = @transform_5, window_bounds = array<i64: 32, 128>}, {transform_indices = @transform_6, window_bounds = array<i64: 32, 128>}]} {
    %c0 = arith.constant 0 : index
    %c0_0 = arith.constant 0 : index
    %0 = vector.load %arg1[%c0, %c0_0] : memref<32x128xf32, #tpu.memory_space<vmem>>, vector<32x128xf32>
    %c0_1 = arith.constant 0 : index
    %c0_2 = arith.constant 0 : index
    %1 = vector.load %arg2[%c0_1, %c0_2] : memref<128x128xf32, #tpu.memory_space<vmem>>, vector<128x128xf32>
    %cst = arith.constant dense<0.000000e+00> : vector<32x128xf32>
    %2 = tpu.matmul %0, %1, %cst {dimension_numbers = #tpu.dot_dimension_numbers<[1], [0], [0], [1], [0, 0, 1, 1], [], []>} : vector<32x128xf32>, vector<128x128xf32>, vector<32x128xf32> -> vector<32x128xf32>
    %c0_3 = arith.constant 0 : index
    %c0_4 = arith.constant 0 : index
    %3 = vector.load %arg5[%c0_3, %c0_4] : memref<32x128xf32, #tpu.memory_space<vmem>>, vector<32x128xf32>
    tpu.vector_store %arg5[%c0_3, %c0_4], %2 {strides = array<i32>} : memref<32x128xf32, #tpu.memory_space<vmem>>, vector<32x128xf32>,
    %c0_5 = arith.constant 0 : index
    %c0_6 = arith.constant 0 : index
    %4 = vector.load %arg3[%c0_5, %c0_6] : memref<128x128xf32, #tpu.memory_space<vmem>>, vector<128x128xf32>
    %cst_7 = arith.constant dense<0.000000e+00> : vector<32x128xf32>
    %5 = tpu.matmul %0, %4, %cst_7 {dimension_numbers = #tpu.dot_dimension_numbers<[1], [0], [0], [1], [0, 0, 1, 1], [], []>} : vector<32x128xf32>, vector<128x128xf32>, vector<32x128xf32> -> vector<32x128xf32>
    %c0_8 = arith.constant 0 : index
    %c0_9 = arith.constant 0 : index
    %6 = vector.load %arg6[%c0_8, %c0_9] : memref<32x128xf32, #tpu.memory_space<vmem>>, vector<32x128xf32>
    tpu.vector_store %arg6[%c0_8, %c0_9], %5 {strides = array<i32>} : memref<32x128xf32, #tpu.memory_space<vmem>>, vector<32x128xf32>,
    %c0_10 = arith.constant 0 : index
    %c0_11 = arith.constant 0 : index
    %7 = vector.load %arg4[%c0_10, %c0_11] : memref<128x128xf32, #tpu.memory_space<vmem>>, vector<128x128xf32>
    %cst_12 = arith.constant dense<0.000000e+00> : vector<32x128xf32>
    %8 = tpu.matmul %0, %7, %cst_12 {dimension_numbers = #tpu.dot_dimension_numbers<[1], [0], [0], [1], [0, 0, 1, 1], [], []>} : vector<32x128xf32>, vector<128x128xf32>, vector<32x128xf32> -> vector<32x128xf32>
    %c0_13 = arith.constant 0 : index
    %c0_14 = arith.constant 0 : index
    %9 = vector.load %arg7[%c0_13, %c0_14] : memref<32x128xf32, #tpu.memory_space<vmem>>, vector<32x128xf32>
    tpu.vector_store %arg7[%c0_13, %c0_14], %8 {strides = array<i32>} : memref<32x128xf32, #tpu.memory_space<vmem>>, vector<32x128xf32>,
    return
  }
  func.func @transform_0(%arg0: i32) -> (i32, i32) {
    %c0_i32 = arith.constant 0 : i32
    %c0_i32_0 = arith.constant 0 : i32
    return %arg0, %c0_i32 : i32, i32
  }
  func.func @transform_1(%arg0: i32) -> (i32, i32) {
    %c0_i32 = arith.constant 0 : i32
    %c0_i32_0 = arith.constant 0 : i32
    %c0_i32_1 = arith.constant 0 : i32
    return %c0_i32, %c0_i32_0 : i32, i32
  }
  func.func @transform_2(%arg0: i32) -> (i32, i32) {
    %c0_i32 = arith.constant 0 : i32
    %c1_i32 = arith.constant 1 : i32
    %c0_i32_0 = arith.constant 0 : i32
    return %c0_i32, %c1_i32 : i32, i32
  }
  func.func @transform_3(%arg0: i32) -> (i32, i32) {
    %c0_i32 = arith.constant 0 : i32
    %c2_i32 = arith.constant 2 : i32
    %c0_i32_0 = arith.constant 0 : i32
    return %c0_i32, %c2_i32 : i32, i32
  }
  func.func @transform_4(%arg0: i32) -> (i32, i32) {
    %c0_i32 = arith.constant 0 : i32
    %c0_i32_0 = arith.constant 0 : i32
    return %arg0, %c0_i32 : i32, i32
  }
  func.func @transform_5(%arg0: i32) -> (i32, i32) {
    %c0_i32 = arith.constant 0 : i32
    %c0_i32_0 = arith.constant 0 : i32
    return %arg0, %c0_i32 : i32, i32
  }
  func.func @transform_6(%arg0: i32) -> (i32, i32) {
    %c0_i32 = arith.constant 0 : i32
    %c0_i32_0 = arith.constant 0 : i32
    return %arg0, %c0_i32 : i32, i32
  }
}

</mosaic_0001>

<bundles_post_ra>
// kernel: tpu_custom_call.1
= control target key start
LH: loop header
LB: loop body
LE: loop exit
PB: predicated region body
PF: predicated region fallthrough
CT: control target
= control target key end

     0   :  { %6 = vsyncpa [#allocation3], 0  ;;  %s114_s0 = inlined_call_operand.hbm [shape: f32[8,128], index: 0, kind: input, shape index: {}]   ;;  %s115_s1 = inlined_call_operand.hbm [shape: f32[8,128], index: 1, kind: output, shape index: {}]  }
   0x1   :  { %7 = vsyncpa [#allocation4], 0  ;;  %s13_s8 = sshll.u32 %s114_s0, 4  ;;  %s96_s9 = smov [#allocation2]   ;;  %s14_s8 = int_to_ptr.hbm [resolvable:$true] %s13_s8 }
   0x2   :  { %s15_s10 = sshll.u32 %s96_s9, 4  ;;  %s16_s10 = int_to_ptr.vmem [resolvable:$true] %s15_s10 }
   0x3   :  { %18 = dma.hbm_to_vmem [thread:$0]  %s14_s8, 128, %s16_s10, [#allocation3]  }
   0x4   :  { %92 = dma.done.wait [#allocation3], 128  }
   0x5   :  { %93 = vsyncadd [#allocation3], 4294967168  ;;  %s97_s11 = smov [#allocation5]   ;;  %s32_s15 = sshll.u32 %s115_s1, 4  ;;  %v23_v0 = vld [vmem:[#allocation2] sm:$0xff]  ;;  %s33_s15 = int_to_ptr.hbm [resolvable:$true] %s32_s15 }
   0x6   :  { %s30_s12 = sshll.u32 %s97_s11, 4  ;;  %24 = vst [vmem:[#allocation5] sm:$0xff] %v23_v0  ;;  %s31_s12 = int_to_ptr.vmem [resolvable:$true] %s30_s12 }
   0x7   :  { %35 = dma.vmem_to_hbm [thread:$0]  %s31_s12, 128, %s33_s15, [#allocation4]  }
   0x8   :  { %94 = dma.done.wait [#allocation4], 128  }
   0x9   :  { %95 = vsyncadd [#allocation4], 4294967168 }
   0xa   :  { %40 = vsyncpa [#allocation3], 1 }
   0xb   :  { %41 = vsyncpa [#allocation4], 1 }

// kernel: tpu_custom_call.1
= control target key start
LH: loop header
LB: loop body
LE: loop exit
PB: predicated region body
PF: predicated region fallthrough
CT: control target
= control target key end

     0   :  { %12 = vsyncpa [#allocation3], 0  ;;  %s582_s0 = inlined_call_operand.hbm [shape: f32[32,128], index: 0, kind: input, shape index: {}]   ;;  %s583_s1 = inlined_call_operand.hbm [shape: f32[128,384], index: 1, kind: input, shape index: {}]   ;;  %s584_s2 = inlined_call_operand.hbm [shape: f32[128,384], index: 2, kind: input, shape index: {}]   ;;  %s585_s3 = inlined_call_operand.hbm [shape: f32[128,384], index: 3, kind: input, shape index: {}]   ;;  %s586_s4 = inlined_call_operand.hbm [shape: f32[32,128], index: 4, kind: output, shape index: {0}]   ;;  %s587_s5 = inlined_call_operand.hbm [shape: f32[32,128], index: 5, kind: output, shape index: {1}]   ;;  %s588_s6 = inlined_call_operand.hbm [shape: f32[32,128], index: 6, kind: output, shape index: {2}]  }
   0x1   :  { %13 = vsyncpa [#allocation6], 0 }
   0x2   :  { %14 = vsyncpa [#allocation9], 0 }
   0x3   :  { %15 = vsyncpa [#allocation4], 0 }
   0x4   :  { %16 = vsyncpa [#allocation12], 0  ;;  %s34_s23 = sshll.u32 %s583_s1, 4  ;;  %s498_s24 = smov [#allocation5]   ;;  %s35_s23 = int_to_ptr.hbm [resolvable:$true] %s34_s23 }
   0x5   :  { %s36_s25 = sshll.u32 %s498_s24, 4  ;;  %s499_s26 = smov 384   ;;  %s37_s25 = int_to_ptr.vmem [resolvable:$true] %s36_s25 }
   0x6   :  { %s500_s27 = smov 128   ;;  %s501_s28 = smov 8  }
   0x7   :  { %42 = dma.hbm_to_vmem [thread:$0]  %s35_s23, 2048, %s37_s25, [#allocation6], %s499_s26, %s500_s27, %s501_s28  }
   0x8   :  { %s21_s7 = sshll.u32 %s582_s0, 4  ;;  %s502_s8 = smov [#allocation2]   ;;  %s22_s7 = int_to_ptr.hbm [resolvable:$true] %s21_s7 }
   0x9   :  { %s23_s9 = sshll.u32 %s502_s8, 4  ;;  %s47_s11 = scalar_lea.hbm %s584_s2, 8  ;;  %s24_s9 = int_to_ptr.vmem [resolvable:$true] %s23_s9 }
   0xa   :  { %29 = dma.hbm_to_vmem [thread:$0]  %s22_s7, 512, %s24_s9, [#allocation3], %s500_s27, %s500_s27, %s501_s28  }
   0xb   :  { %s48_s12 = sshll.u32 %s47_s11, 4  ;;  %s503_s13 = smov [#allocation7]   ;;  %s49_s12 = int_to_ptr.hbm [resolvable:$true] %s48_s12 }
   0xc   :  { %s50_s14 = sshll.u32 %s503_s13, 4  ;;  %s61_s0 = scalar_lea.hbm %s585_s3, 16  ;;  %s51_s14 = int_to_ptr.vmem [resolvable:$true] %s50_s14 }
   0xd   :  { %56 = dma.hbm_to_vmem [thread:$0]  %s49_s12, 2048, %s51_s14, [#allocation6], %s499_s26, %s500_s27, %s501_s28  }
   0xe   :  { %s62_s17 = sshll.u32 %s61_s0, 4  ;;  %s504_s18 = smov [#allocation8]   ;;  %s63_s17 = int_to_ptr.hbm [resolvable:$true] %s62_s17 }
   0xf   :  { %s64_s2 = sshll.u32 %s504_s18, 4  ;;  %s65_s2 = int_to_ptr.vmem [resolvable:$true] %s64_s2 }
  0x10   :  { %70 = dma.hbm_to_vmem [thread:$0]  %s63_s17, 2048, %s65_s2, [#allocation9], %s499_s26, %s500_s27, %s501_s28  }
  0x11   :  { %488 = dma.done.wait [#allocation3], 512  }
  0x12   :  { %489 = vsyncadd [#allocation3], 4294966784 }
  0x13   :  { %490 = dma.done.wait [#allocation6], 4096  }
  0x14   :  { %491 = vsyncadd [#allocation6], 4294963200 }
  0x15   :  { %492 = dma.done.wait [#allocation9], 2048  }
  0x16   :  { %493 = vsyncadd [#allocation9], 4294965248  ;;  %v204_v0 = vld [vmem:[#allocation8 + $0x78] sm:$0xff]  ;;  %v203_v1 = vld [vmem:[#allocation8 + $0x70] sm:$0xff]  ;;  %s505_s3 = smov [#allocation10]   ;;  %s244_s22 = sshll.u32 %s586_s4, 4  ;;  %s245_s22 = int_to_ptr.hbm [resolvable:$true] %s244_s22 }
  0x17   :  { %205 = vmatpush.msra.mxu2 %v204_v0  ;;  %v155_v2 = vld [vmem:[#allocation7 + $0x78] sm:$0xff]  ;;  %v154_v3 = vld [vmem:[#allocation7 + $0x70] sm:$0xff]  ;;  %v202_v4 = vld [vmem:[#allocation8 + $0x68] sm:$0xff]  ;;  %s242_s19 = sshll.u32 %s505_s3, 4  ;;  %s506_s23 = smov [#allocation11]   ;;  %s243_s19 = int_to_ptr.vmem [resolvable:$true] %s242_s19 }
  0x18   :  { %156 = vmatpush.msra.mxu1 %v155_v2  ;;  %v106_v5 = vld [vmem:[#allocation5 + $0x78] sm:$0xff]  ;;  %v153_v6 = vld [vmem:[#allocation7 + $0x68] sm:$0xff]  ;;  %v105_v7 = vld [vmem:[#allocation5 + $0x70] sm:$0xff]  ;;  %s255_s24 = sshll.u32 %s506_s23, 4  ;;  %s257_s29 = sshll.u32 %s587_s5, 4  ;;  %s256_s24 = int_to_ptr.vmem [resolvable:$true] %s255_s24  ;;  %s258_s29 = int_to_ptr.hbm [resolvable:$true] %s257_s29 }
  0x19   :  { %206 = vmatpush.msra.mxu2 %v203_v1  ;;  %294 = vmatpush.msra.mxu3 %v106_v5  ;;  %v201_v8 = vld [vmem:[#allocation8 + $0x60] sm:$0xff]  ;;  %v104_v9 = vld [vmem:[#allocation5 + $0x68] sm:$0xff]  ;;  %v200_v11 = vld [vmem:[#allocation8 + $0x58] sm:$0xff]  ;;  %s507_s30 = smov [#allocation13]   ;;  %s270_s4 = sshll.u32 %s588_s6, 4  ;;  %s271_s4 = int_to_ptr.hbm [resolvable:$true] %s270_s4 }
  0x1a   :  { %157 = vmatpush.msra.mxu1 %v154_v3  ;;  %107 = vmatpush.msra.mxu0 %v106_v5  ;;  %v152_v10 = vld [vmem:[#allocation7 + $0x60] sm:$0xff]  ;;  %v151_v13 = vld [vmem:[#allocation7 + $0x58] sm:$0xff]  ;;  %v199_v14 = vld [vmem:[#allocation8 + $0x50] sm:$0xff]  ;;  %s268_s7 = sshll.u32 %s507_s30, 4  ;;  %s269_s7 = int_to_ptr.vmem [resolvable:$true] %s268_s7 }
  0x1b   :  { %207 = vmatpush.msra.mxu2 %v202_v4  ;;  %295 = vmatpush.msra.mxu3 %v105_v7  ;;  %v103_v12 = vld [vmem:[#allocation5 + $0x60] sm:$0xff]  ;;  %v102_v15 = vld [vmem:[#allocation5 + $0x58] sm:$0xff]  ;;  %v150_v16 = vld [vmem:[#allocation7 + $0x50] sm:$0xff] }
  0x1c   :  { %158 = vmatpush.msra.mxu1 %v153_v6  ;;  %108 = vmatpush.msra.mxu0 %v105_v7  ;;  %v198_v17 = vld [vmem:[#allocation8 + $0x48] sm:$0xff]  ;;  %v101_v18 = vld [vmem:[#allocation5 + $0x50] sm:$0xff]  ;;  %v197_v20 = vld [vmem:[#allocation8 + $0x40] sm:$0xff] }
  0x1d   :  { %208 = vmatpush.msra.mxu2 %v201_v8  ;;  %296 = vmatpush.msra.mxu3 %v104_v9  ;;  %v149_v19 = vld [vmem:[#allocation7 + $0x48] sm:$0xff]  ;;  %v148_v22 = vld [vmem:[#allocation7 + $0x40] sm:$0xff]  ;;  %v196_v23 = vld [vmem:[#allocation8 + $0x38] sm:$0xff] }
  0x1e   :  { %159 = vmatpush.msra.mxu1 %v152_v10  ;;  %109 = vmatpush.msra.mxu0 %v104_v9  ;;  %v100_v21 = vld [vmem:[#allocation5 + $0x48] sm:$0xff]  ;;  %v99_v24 = vld [vmem:[#allocation5 + $0x40] sm:$0xff]  ;;  %v147_v25 = vld [vmem:[#allocation7 + $0x38] sm:$0xff] }
  0x1f   :  { %209 = vmatpush.msra.mxu2 %v200_v11  ;;  %297 = vmatpush.msra.mxu3 %v103_v12  ;;  %v195_v26 = vld [vmem:[#allocation8 + $0x30] sm:$0xff]  ;;  %v98_v27 = vld [vmem:[#allocation5 + $0x38] sm:$0xff]  ;;  %v194_v29 = vld [vmem:[#allocation8 + $0x28] sm:$0xff] }
  0x20   :  { %160 = vmatpush.msra.mxu1 %v151_v13  ;;  %110 = vmatpush.msra.mxu0 %v103_v12  ;;  %v146_v28 = vld [vmem:[#allocation7 + $0x30] sm:$0xff]  ;;  %v145_v31 = vld [vmem:[#allocation7 + $0x28] sm:$0xff]  ;;  %v193_v32 = vld [vmem:[#allocation8 + $0x20] sm:$0xff] }
  0x21   :  { %210 = vmatpush.msra.mxu2 %v199_v14  ;;  %298 = vmatpush.msra.mxu3 %v102_v15  ;;  %v97_v30 = vld [vmem:[#allocation5 + $0x30] sm:$0xff]  ;;  %v96_v33 = vld [vmem:[#allocation5 + $0x28] sm:$0xff]  ;;  %v144_v34 = vld [vmem:[#allocation7 + $0x20] sm:$0xff] }
  0x22   :  { %161 = vmatpush.msra.mxu1 %v150_v16  ;;  %111 = vmatpush.msra.mxu0 %v102_v15  ;;  %v192_v35 = vld [vmem:[#allocation8 + $0x18] sm:$0xff]  ;;  %v95_v36 = vld [vmem:[#allocation5 + $0x20] sm:$0xff]  ;;  %v191_v38 = vld [vmem:[#allocation8 + $0x10] sm:$0xff] }
  0x23   :  { %211 = vmatpush.msra.mxu2 %v198_v17  ;;  %299 = vmatpush.msra.mxu3 %v101_v18  ;;  %v143_v37 = vld [vmem:[#allocation7 + $0x18] sm:$0xff]  ;;  %v142_v40 = vld [vmem:[#allocation7 + $0x10] sm:$0xff]  ;;  %v190_v41 = vld [vmem:[#allocation8 + $0x8] sm:$0xff] }
  0x24   :  { %162 = vmatpush.msra.mxu1 %v149_v19  ;;  %112 = vmatpush.msra.mxu0 %v101_v18  ;;  %v94_v39 = vld [vmem:[#allocation5 + $0x18] sm:$0xff]  ;;  %v93_v42 = vld [vmem:[#allocation5 + $0x10] sm:$0xff]  ;;  %v141_v43 = vld [vmem:[#allocation7 + $0x8] sm:$0xff] }
  0x25   :  { %212 = vmatpush.msra.mxu2 %v197_v20  ;;  %300 = vmatpush.msra.mxu3 %v100_v21  ;;  %v189_v44 = vld [vmem:[#allocation8] sm:$0xff]  ;;  %v92_v45 = vld [vmem:[#allocation5 + $0x8] sm:$0xff]  ;;  %v89_v50 = vld [vmem:[#allocation2 + $0x10] sm:$0xff] }
  0x26   :  { %163 = vmatpush.msra.mxu1 %v148_v22  ;;  %113 = vmatpush.msra.mxu0 %v100_v21  ;;  %v87_v46 = vld [vmem:[#allocation2] sm:$0xff]  ;;  %v88_v49 = vld [vmem:[#allocation2 + $0x8] sm:$0xff]  ;;  %v90_v51 = vld [vmem:[#allocation2 + $0x18] sm:$0xff] }
  0x27   :  { %213 = vmatpush.msra.mxu2 %v196_v23  ;;  %301 = vmatpush.msra.mxu3 %v99_v24  ;;  %v140_v47 = vld [vmem:[#allocation7] sm:$0xff] }
  0x28   :  { %164 = vmatpush.msra.mxu1 %v147_v25  ;;  %114 = vmatpush.msra.mxu0 %v99_v24  ;;  %v91_v48 = vld [vmem:[#allocation5] sm:$0xff] }
  0x29   :  { %214 = vmatpush.msra.mxu2 %v195_v26  ;;  %302 = vmatpush.msra.mxu3 %v98_v27 }
  0x2a   :  { %165 = vmatpush.msra.mxu1 %v146_v28  ;;  %115 = vmatpush.msra.mxu0 %v98_v27 }
  0x2b   :  { %215 = vmatpush.msra.mxu2 %v194_v29  ;;  %303 = vmatpush.msra.mxu3 %v97_v30 }
  0x2c   :  { %166 = vmatpush.msra.mxu1 %v145_v31  ;;  %116 = vmatpush.msra.mxu0 %v97_v30 }
  0x2d   :  { %216 = vmatpush.msra.mxu2 %v193_v32  ;;  %304 = vmatpush.msra.mxu3 %v96_v33 }
  0x2e   :  { %167 = vmatpush.msra.mxu1 %v144_v34  ;;  %117 = vmatpush.msra.mxu0 %v96_v33 }
  0x2f   :  { %217 = vmatpush.msra.mxu2 %v192_v35  ;;  %305 = vmatpush.msra.mxu3 %v95_v36 }
  0x30   :  { %168 = vmatpush.msra.mxu1 %v143_v37  ;;  %118 = vmatpush.msra.mxu0 %v95_v36 }
  0x31   :  { %218 = vmatpush.msra.mxu2 %v191_v38  ;;  %306 = vmatpush.msra.mxu3 %v94_v39 }
  0x32   :  { %169 = vmatpush.msra.mxu1 %v142_v40  ;;  %119 = vmatpush.msra.mxu0 %v94_v39 }
  0x33   :  { %219 = vmatpush.msra.mxu2 %v190_v41  ;;  %307 = vmatpush.msra.mxu3 %v93_v42 }
  0x34   :  { %170 = vmatpush.msra.mxu1 %v141_v43  ;;  %120 = vmatpush.msra.mxu0 %v93_v42 }
  0x35   :  { %220 = vmatpush.msra.mxu2 %v189_v44  ;;  %308 = vmatpush.msra.mxu3 %v92_v45 }
  0x36   :  { %221 = vmatmul.f32.vlgmr.msra.gmra.mxu2 %v87_v46  ;;  %171 = vmatpush.msra.mxu1 %v140_v47 }
  0x37   :  { %172 = vmatmul.f32.vlgmr.msra.gmra.mxu1 %v87_v46  ;;  %309 = vmatpush.msra.mxu3 %v91_v48 }
  0x38   :  { %126 = vmatmul.f32.vlgmr.msra.gmra.mxu3 %v88_v49  ;;  %121 = vmatpush.msra.mxu0 %v92_v45 }
  0x3a   :  { %122 = vmatpush.msra.mxu0 %v91_v48 }
  0x3b   :  { %123 = vmatmul.f32.vlgmr.msra.gmra.mxu0 %v87_v46 }
  0x3e   :  { %224 = vmatmul.f32.gmra.mxu2 %v88_v49 }
  0x3f   :  { %175 = vmatmul.f32.gmra.mxu1 %v88_v49 }
  0x40   :  { %129 = vmatmul.f32.gmra.mxu3 %v89_v50 }
  0x46   :  { %227 = vmatmul.f32.gmra.mxu2 %v89_v50 }
  0x47   :  { %178 = vmatmul.f32.gmra.mxu1 %v89_v50 }
  0x48   :  { %132 = vmatmul.f32.gmra.mxu3 %v90_v51 }
  0x4e   :  { %230 = vmatmul.f32.gmra.mxu2 %v90_v51 }
  0x4f   :  { %181 = vmatmul.f32.gmra.mxu1 %v90_v51 }
  0xb4   :  { %v173_v52 = vpop.f32.mrf.mxu1 }
  0xb5   :  { %185 = vst [vmem:[#allocation11] sm:$0xff] %v173_v52 }
  0xb8   :  { %v124_v53 = vpop.f32.mrf.mxu0 }
  0xb9   :  { %v222_v54 = vpop.f32.mrf.mxu2  ;;  %136 = vst [vmem:[#allocation10] sm:$0xff] %v124_v53 }
  0xba   :  { %234 = vst [vmem:[#allocation13] sm:$0xff] %v222_v54 }
  0xbb   :  { %v127_v55 = vpop.f32.mrf.mxu3 }
  0xbc   :  { %v176_v56 = vpop.f32.mrf.mxu1  ;;  %137 = vst [vmem:[#allocation10 + $0x8] sm:$0xff] %v127_v55 }
  0xbd   :  { %186 = vst [vmem:[#allocation11 + $0x8] sm:$0xff] %v176_v56 }
  0xc1   :  { %v225_v57 = vpop.f32.mrf.mxu2 }
  0xc2   :  { %235 = vst [vmem:[#allocation13 + $0x8] sm:$0xff] %v225_v57 }
  0xc3   :  { %v130_v58 = vpop.f32.mrf.mxu3 }
  0xc4   :  { %v179_v59 = vpop.f32.mrf.mxu1  ;;  %138 = vst [vmem:[#allocation10 + $0x10] sm:$0xff] %v130_v58 }
  0xc5   :  { %187 = vst [vmem:[#allocation11 + $0x10] sm:$0xff] %v179_v59 }
  0xc9   :  { %v228_v60 = vpop.f32.mrf.mxu2 }
  0xca   :  { %236 = vst [vmem:[#allocation13 + $0x10] sm:$0xff] %v228_v60 }
  0xcb   :  { %v133_v61 = vpop.f32.mrf.mxu3 }
  0xcc   :  { %v182_v62 = vpop.f32.mrf.mxu1  ;;  %139 = vst [vmem:[#allocation10 + $0x18] sm:$0xff] %v133_v61 }
  0xcd   :  { %188 = vst [vmem:[#allocation11 + $0x18] sm:$0xff] %v182_v62  ;;  %250 = dma.vmem_to_hbm [thread:$0]  %s243_s19, 512, %s245_s22, [#allocation4], %s500_s27, %s500_s27, %s501_s28  }
  0xce   :  { %263 = dma.vmem_to_hbm [thread:$0]  %s256_s24, 512, %s258_s29, [#allocation12], %s500_s27, %s500_s27, %s501_s28  }
  0xd1   :  { %v231_v63 = vpop.f32.mrf.mxu2 }
  0xd2   :  { %237 = vst [vmem:[#allocation13 + $0x18] sm:$0xff] %v231_v63 }
  0xd3   :  { %276 = dma.vmem_to_hbm [thread:$0]  %s269_s7, 512, %s271_s4, [#allocation12], %s500_s27, %s500_s27, %s501_s28  }
  0xd4   :  { %494 = dma.done.wait [#allocation4], 512  }
  0xd5   :  { %495 = vsyncadd [#allocation4], 4294966784 }
  0xd6   :  { %496 = dma.done.wait [#allocation12], 1024  }
  0xd7   :  { %497 = vsyncadd [#allocation12], 4294966272 }
  0xd8   :  { %289 = vsyncpa [#allocation3], 1 }
  0xd9   :  { %290 = vsyncpa [#allocation6], 1 }
  0xda   :  { %291 = vsyncpa [#allocation9], 1 }
  0xdb   :  { %292 = vsyncpa [#allocation4], 1 }
  0xdc   :  { %293 = vsyncpa [#allocation12], 1 }

</bundles_post_ra>
